<compile_context>
chip_gen: v6e
topology: v6e:2x2x1
jax: 0.10.0
libtpu: 0.0.40
codegen_flags: <defaults>
</compile_context>

<pallas_src>
import jax
import jax.numpy as jnp
from jax.experimental import pallas as pl
from jax.experimental.pallas import tpu as pltpu


def gcn_kernel(adj_ref, x_ref, w_ref, b_ref, o_ref):
    # adj_ref: (block_b, J, J)      compute dtype
    # x_ref:   (block_b * J, Fin)   compute dtype
    # w_ref:   (Fin, Fout)          compute dtype
    # b_ref:   (1, Fout)            float32
    # o_ref:   (block_b, J, Fout)   float32
    block_b, num_joints, _ = adj_ref.shape
    out_features = w_ref.shape[1]

    # One fused MXU matmul over all block_b * J rows, f32 accumulation.
    support = jnp.dot(
        x_ref[...], w_ref[...], preferred_element_type=jnp.float32
    )  # (block_b*J, Fout) f32

    # Split rows back into (batch, joint) -- leading-dim split, layout preserving.
    support = support.reshape(block_b, num_joints, out_features)
    support = support.astype(adj_ref.dtype)

    # Batched adjacency contraction:
    #   out[b, i, f] = sum_j adj[b, i, j] * support[b, j, f]
    out = jax.lax.dot_general(
        adj_ref[...],
        support,
        dimension_numbers=(((2,), (1,)), ((0,), (0,))),
        preferred_element_type=jnp.float32,
    )  # (block_b, J, Fout) f32

    # Bias add in f32, then store (Fout stays on the lane axis).
    o_ref[...] = (out + b_ref[...]).astype(o_ref.dtype)


def graph_convolution(adjacency_matrix, x, weight, bias, *,
                      block_b=None, compute_dtype=jnp.bfloat16):
    """Pallas implementation of GraphConvolution.forward.

    adjacency_matrix: (B, J, J) float32
    x:                (B, J, Fin) float32
    weight:           (Fin, Fout) float32
    bias:             (Fout,) float32
    returns:          (B, J, Fout) float32
    """
    B, J, Fin = x.shape
    Fout = weight.shape[1]
    out_dtype = x.dtype

    # --- choose the batch tile --------------------------------------------------
    if block_b is None:
        # Target block_b*J >= 256 rows for the fused x@W matmul (>=128 already
        # saturates v5e's MXU).  At large B this also yields a multi-step grid so
        # the "parallel" batch axis can be sharded across v7x's two TensorCores.
        block_b = max(1, min(B, pl.cdiv(256, J)))
        # Keep the flattened row tile a multiple of 8 sublanes (or the full array).
        while (block_b * J) % 8 != 0 and block_b < B:
            block_b += 1
    num_blocks = pl.cdiv(B, block_b)
    Bp = num_blocks * block_b

    # Pad the batch so B divides evenly into block_b-sized tiles (padded rows are
    # zeros and sliced off at the end).
    if Bp != B:
        pad = Bp - B
        adjacency_matrix = jnp.pad(adjacency_matrix, ((0, pad), (0, 0), (0, 0)))
        x = jnp.pad(x, ((0, pad), (0, 0), (0, 0)))

    # bf16 (default) halves DMA bytes and uses the bf16-native MXU; accumulation
    # stays f32 inside the kernel.  compute_dtype=jnp.float32 is the exact path.
    adj_c = adjacency_matrix.astype(compute_dtype)
    x_flat = x.reshape(Bp * J, Fin).astype(compute_dtype)
    w_c = weight.astype(compute_dtype)
    bias2d = bias.reshape(1, Fout).astype(jnp.float32)

    # --- VMEM budget (double-buffered blocks + resident weight/bias) -------------
    c_item = jnp.dtype(compute_dtype).itemsize
    o_item = jnp.dtype(out_dtype).itemsize
    block_bytes = block_b * J * (J + Fin) * c_item + block_b * J * Fout * o_item
    resident_bytes = Fin * Fout * c_item + Fout * 4
    vmem_need = 2 * block_bytes + 2 * resident_bytes
    # Keep well under v7x's 64 MiB physical VMEM; 4x headroom for compiler
    # scratch, floored at the 32 MiB default scoped limit.
    vmem_limit = int(min(64 * 1024 * 1024, max(32 * 1024 * 1024, 4 * vmem_need)))

    flops = 2 * Bp * J * Fout * (Fin + J)
    bytes_accessed = (adj_c.size * c_item + x_flat.size * c_item
                      + w_c.size * c_item + bias2d.size * 4
                      + Bp * J * Fout * o_item)

    out = pl.pallas_call(
        gcn_kernel,
        out_shape=jax.ShapeDtypeStruct((Bp, J, Fout), out_dtype),
        grid_spec=pltpu.PrefetchScalarGridSpec(
            num_scalar_prefetch=0,
            grid=(num_blocks,),
            in_specs=[
                pl.BlockSpec((block_b, J, J), lambda b: (b, 0, 0)),
                pl.BlockSpec((block_b * J, Fin), lambda b: (b, 0)),
                # Constant index_maps: weight/bias are DMA'd once and stay
                # resident across grid steps.  (At production Fin x Fout sizes,
                # consider single-buffering them to save one VMEM copy.)
                pl.BlockSpec((Fin, Fout), lambda b: (0, 0)),
                pl.BlockSpec((1, Fout), lambda b: (0, 0)),
            ],
            out_specs=pl.BlockSpec((block_b, J, Fout), lambda b: (b, 0, 0)),
        ),
        compiler_params=pltpu.CompilerParams(
            dimension_semantics=("parallel",),
            vmem_limit_bytes=vmem_limit,
        ),
        cost_estimate=pl.CostEstimate(
            flops=flops, transcendentals=0, bytes_accessed=bytes_accessed),
    )(adj_c, x_flat, w_c, bias2d)

    if Bp != B:
        out = out[:B]
    return out


def xavier_uniform(key, in_features, out_features, dtype=jnp.float32):
    # Matches torch.nn.init.xavier_uniform_ (gain=1).
    bound = (6.0 / (in_features + out_features)) ** 0.5
    return jax.random.uniform(
        key, (in_features, out_features), dtype=dtype, minval=-bound, maxval=bound
    )


if __name__ == "__main__":
    B, J, Fin, Fout = 2, 8, 32, 32

    key = jax.random.PRNGKey(0)
    k_adj, k_x, k_w, k_b = jax.random.split(key, 4)

    adjacency = jax.random.uniform(k_adj, (B, J, J), dtype=jnp.float32)
    x = jax.random.normal(k_x, (B, J, Fin), dtype=jnp.float32)
    weight = xavier_uniform(k_w, Fin, Fout)
    bias = 0.1 * jax.random.normal(k_b, (Fout,), dtype=jnp.float32)

    # Pure-JAX reference (module semantics).
    support = x.reshape(-1, Fin) @ weight
    ref = jnp.einsum("bij,bjf->bif", adjacency, support.reshape(B, J, Fout)) + bias

    # Exact-precision path (f32 everywhere) -- strict check.
    out_f32 = graph_convolution(adjacency, x, weight, bias,
                                compute_dtype=jnp.float32)
    out_f32 = jax.block_until_ready(out_f32)
    assert out_f32.shape == (B, J, Fout)
    assert jnp.allclose(out_f32, ref, atol=1e-4, rtol=1e-4)

    # Default performance path (bf16 MXU inputs, f32 accumulation) -- loose check.
    out_bf16 = graph_convolution(adjacency, x, weight, bias)
    out_bf16 = jax.block_until_ready(out_bf16)
    assert out_bf16.shape == (B, J, Fout)
    assert jnp.allclose(out_bf16, ref, atol=0.15, rtol=0.05)

    print("KERNEL_OK")
</pallas_src>

<mosaic_0001>
module attributes {stable_mosaic.version = 11 : i64} {
  func.func @gcn_kernel(%arg0: i32, %arg1: memref<2x8x8xf32, #tpu.memory_space<vmem>>, %arg2: memref<16x32xf32, #tpu.memory_space<vmem>>, %arg3: memref<32x32xf32, #tpu.memory_space<vmem>>, %arg4: memref<1x32xf32, #tpu.memory_space<vmem>>, %arg5: memref<2x8x32xf32, #tpu.memory_space<vmem>>) attributes {dimension_semantics = [#tpu.dimension_semantics<parallel>], iteration_bounds = array<i64: 1>, scalar_prefetch = 0 : i64, scratch_operands = 0 : i64, tpu.core_type = #tpu.core_type<tc>, window_params = [{transform_indices = @transform_0, window_bounds = array<i64: 2, 8, 8>}, {transform_indices = @transform_1, window_bounds = array<i64: 16, 32>}, {pipeline_mode = #tpu.pipeline_mode<synchronous>, transform_indices = @transform_2, window_bounds = array<i64: 32, 32>}, {pipeline_mode = #tpu.pipeline_mode<synchronous>, transform_indices = @transform_3, window_bounds = array<i64: 1, 32>}, {transform_indices = @transform_4, window_bounds = array<i64: 2, 8, 32>}]} {
    %c0 = arith.constant 0 : index
    %c0_0 = arith.constant 0 : index
    %0 = vector.load %arg2[%c0, %c0_0] : memref<16x32xf32, #tpu.memory_space<vmem>>, vector<16x32xf32>
    %c0_1 = arith.constant 0 : index
    %c0_2 = arith.constant 0 : index
    %1 = vector.load %arg3[%c0_1, %c0_2] : memref<32x32xf32, #tpu.memory_space<vmem>>, vector<32x32xf32>
    %cst = arith.constant dense<0.000000e+00> : vector<16x32xf32>
    %2 = tpu.matmul %0, %1, %cst {dimension_numbers = #tpu.dot_dimension_numbers<[1], [0], [0], [1], [0, 0, 1, 1], [], []>} : vector<16x32xf32>, vector<32x32xf32>, vector<16x32xf32> -> vector<16x32xf32>
    %3 = vector.shape_cast %2 : vector<16x32xf32> to vector<2x8x32xf32>
    %c0_3 = arith.constant 0 : index
    %c0_4 = arith.constant 0 : index
    %c0_5 = arith.constant 0 : index
    %4 = vector.load %arg1[%c0_3, %c0_4, %c0_5] : memref<2x8x8xf32, #tpu.memory_space<vmem>>, vector<2x8x8xf32>
    %cst_6 = arith.constant dense<0.000000e+00> : vector<2x8x32xf32>
    %5 = tpu.matmul %4, %3, %cst_6 {dimension_numbers = #tpu.dot_dimension_numbers<[2], [1], [1], [2], [0, 0, 0, 1, 1, 2], [0], [0]>} : vector<2x8x8xf32>, vector<2x8x32xf32>, vector<2x8x32xf32> -> vector<2x8x32xf32>
    %c0_7 = arith.constant 0 : index
    %c0_8 = arith.constant 0 : index
    %6 = vector.load %arg4[%c0_7, %c0_8] : memref<1x32xf32, #tpu.memory_space<vmem>>, vector<1x32xf32>
    %7 = vector.shape_cast %6 : vector<1x32xf32> to vector<1x1x32xf32>
    %8 = vector.broadcast %7 : vector<1x1x32xf32> to vector<2x8x32xf32>
    %9 = arith.addf %5, %8 : vector<2x8x32xf32>
    %c0_9 = arith.constant 0 : index
    %c0_10 = arith.constant 0 : index
    %c0_11 = arith.constant 0 : index
    %10 = vector.load %arg5[%c0_9, %c0_10, %c0_11] : memref<2x8x32xf32, #tpu.memory_space<vmem>>, vector<2x8x32xf32>
    tpu.vector_store %arg5[%c0_9, %c0_10, %c0_11], %9 {strides = array<i32>} : memref<2x8x32xf32, #tpu.memory_space<vmem>>, vector<2x8x32xf32>,
    return
  }
  func.func @transform_0(%arg0: i32) -> (i32, i32, i32) {
    %c0_i32 = arith.constant 0 : i32
    %c0_i32_0 = arith.constant 0 : i32
    %c0_i32_1 = arith.constant 0 : i32
    return %arg0, %c0_i32, %c0_i32_0 : i32, i32, i32
  }
  func.func @transform_1(%arg0: i32) -> (i32, i32) {
    %c0_i32 = arith.constant 0 : i32
    %c0_i32_0 = arith.constant 0 : i32
    return %arg0, %c0_i32 : i32, i32
  }
  func.func @transform_2(%arg0: i32) -> (i32, i32) {
    %c0_i32 = arith.constant 0 : i32
    %c0_i32_0 = arith.constant 0 : i32
    %c0_i32_1 = arith.constant 0 : i32
    return %c0_i32, %c0_i32_0 : i32, i32
  }
  func.func @transform_3(%arg0: i32) -> (i32, i32) {
    %c0_i32 = arith.constant 0 : i32
    %c0_i32_0 = arith.constant 0 : i32
    %c0_i32_1 = arith.constant 0 : i32
    return %c0_i32, %c0_i32_0 : i32, i32
  }
  func.func @transform_4(%arg0: i32) -> (i32, i32, i32) {
    %c0_i32 = arith.constant 0 : i32
    %c0_i32_0 = arith.constant 0 : i32
    %c0_i32_1 = arith.constant 0 : i32
    return %arg0, %c0_i32, %c0_i32_0 : i32, i32, i32
  }
}

</mosaic_0001>

<bundles_post_ra>
// kernel: tpu_custom_call.1
= control target key start
LH: loop header
LB: loop body
LE: loop exit
PB: predicated region body
PF: predicated region fallthrough
CT: control target
= control target key end

     0   :  { %9 = vsyncpa [#allocation3], 0  ;;  %s517_s0 = inlined_call_operand.hbm [shape: f32[2,8,8], index: 0, kind: input, shape index: {}]   ;;  %s518_s1 = inlined_call_operand.hbm [shape: f32[16,32], index: 1, kind: input, shape index: {}]   ;;  %s519_s2 = inlined_call_operand.hbm [shape: f32[32,32], index: 2, kind: input, shape index: {}]   ;;  %s520_s3 = inlined_call_operand.vmem [shape: f32[1,32], index: 3, kind: input, shape index: {}]   ;;  %s521_s4 = inlined_call_operand.hbm [shape: f32[2,8,32], index: 4, kind: output, shape index: {}]  }
   0x1   :  { %10 = vsyncpa [#allocation6], 0 }
   0x2   :  { %11 = vsyncpa [#allocation4], 0  ;;  %s453_s15 = smov [#allocation5]   ;;  %s454_s17 = smov [#allocation2]  }
   0x3   :  { %s29_s16 = sshll.u32 %s453_s15, 4  ;;  %s17_s18 = sshll.u32 %s454_s17, 4  ;;  %s30_s16 = int_to_ptr.vmem [resolvable:$true] %s29_s16  ;;  %s18_s18 = int_to_ptr.vmem [resolvable:$true] %s17_s18 }
   0x4   :  { %s375_s19 = scalar_lea.vmem %s30_s16, 256  ;;  %p380_p1 = scmp.lt.s32.totalorder %s30_s16, %s30_s16 }
   0x5   :  { %p376_p0 = scmp.ne.s32.totalorder %s30_s16, %s375_s19  ;;  %p381_p2 = scmp.lt.s32.totalorder %s375_s19, %s375_s19 }
   0x7   :  { %p382_p3 = por %p381_p2, %p380_p1 }
   0x9   :  { %p383_p4 = pnand %p382_p3, %p376_p0 }
   0xb   :  { %386 = shalt.err (!%p383_p4)
}
   0xc   :  { %s455_s20 = smov 128   ;;  %s456_s21 = smov 8  }
   0xd   :  { %35 = dma.hbm_to_vmem [thread:$0]  %s518_s1, 256, %s30_s16, [#allocation6], %s455_s20, %s455_s20, %s456_s21  }
   0xe   :  { %s395_s24 = scalar_lea.vmem %s18_s18, 256  ;;  %p400_p6 = scmp.lt.s32.totalorder %s18_s18, %s18_s18 }
   0xf   :  { %p396_p5 = scmp.ne.s32.totalorder %s18_s18, %s395_s24  ;;  %p401_p7 = scmp.lt.s32.totalorder %s395_s24, %s395_s24 }
  0x11   :  { %p402_p8 = por %p401_p7, %p400_p6 }
  0x13   :  { %p403_p9 = pnand %p402_p8, %p396_p5 }
  0x15   :  { %406 = shalt.err (!%p403_p9)
}
  0x16   :  { %23 = dma.hbm_to_vmem [thread:$0]  %s517_s0, 256, %s18_s18, [#allocation3], %s455_s20, %s455_s20, %s456_s21  }
  0x17   :  { %s457_s27 = smov [#allocation7]  }
  0x18   :  { %s41_s28 = sshll.u32 %s457_s27, 4  ;;  %s42_s28 = int_to_ptr.vmem [resolvable:$true] %s41_s28 }
  0x19   :  { %s415_s29 = scalar_lea.vmem %s42_s28, 512  ;;  %p420_p11 = scmp.lt.s32.totalorder %s42_s28, %s42_s28 }
  0x1a   :  { %p416_p10 = scmp.ne.s32.totalorder %s42_s28, %s415_s29  ;;  %p421_p12 = scmp.lt.s32.totalorder %s415_s29, %s415_s29 }
  0x1c   :  { %p422_p13 = por %p421_p12, %p420_p11 }
  0x1e   :  { %p423_p0 = pnand %p422_p13, %p416_p10 }
  0x20   :  { %426 = shalt.err (!%p423_p0)
}
  0x21   :  { %47 = dma.hbm_to_vmem [thread:$0]  %s519_s2, 512, %s42_s28, [#allocation6], %s455_s20, %s455_s20, %s456_s21  }
  0x22   :  { %447 = dma.done.wait [#allocation3], 256  }
  0x23   :  { %448 = vsyncadd [#allocation3], 4294967040 }
  0x24   :  { %449 = dma.done.wait [#allocation6], 768  }
  0x25   :  { %450 = vsyncadd [#allocation6], 4294966528  ;;  %vm65_vm0 = vcmask 261120   ;;  %v64_v0 = vld [vmem:[#allocation7 + $0x18] sm:$0xff]  ;;  %v63_v1 = vld [vmem:[#allocation7 + $0x10] sm:$0xff]  ;;  %v458_v6 = vmov 0.0  }
  0x26   :  { %338 = vmatprep.subr.mxu0 %v64_v0  ;;  %v59_v2 = vld [vmem:[#allocation5] sm:$0xff]  ;;  %v62_v3 = vld [vmem:[#allocation7 + $0x8] sm:$0xff]  ;;  %v61_v4 = vld [vmem:[#allocation7] sm:$0xff]  ;;  %349 = vmatprep.subr.mxu1 %v458_v6  ;;  %vm459_vm1 = vmmov 0   ;;  %vm156_vm2 = vcmask 64512   ;;  %s460_s5 = smov [#allocation8]  }
  0x27   :  { %339 = vmatpush3.msra.mxu0 %v64_v0  ;;  %346 = vmatprep.mubr.msk.f32.mxu0 %vm65_vm0, %v59_v2  ;;  %v60_v5 = vld [vmem:[#allocation5 + $0x8] sm:$0xff]  ;;  %v147_v8 = vld [vmem:[#allocation2] sm:$0xff]  ;;  %v148_v10 = vld [vmem:[#allocation2 + $0x8] sm:$0xff]  ;;  %s310_s6 = sshll.u32 %s460_s5, 4  ;;  %s311_s6 = int_to_ptr.vmem [resolvable:$true] %s310_s6 }
  0x28   :  { %340 = vmatprep.subr.mxu0 %v63_v1  ;;  %351 = vmatprep.mubr.msk.f32.mxu1 %vm459_vm1, %v458_v6  ;;  %v325_v11 = vld [vmem:[%s520_s3] ss:$0 sm:$0xff]  ;;  %s427_s7 = scalar_lea.vmem %s311_s6, 256  ;;  %p432_p2 = scmp.lt.s32.totalorder %s311_s6, %s311_s6 }
  0x29   :  { %341 = vmatpush3.msra.mxu0 %v63_v1  ;;  %p428_p1 = scmp.ne.s32.totalorder %s311_s6, %s427_s7  ;;  %p433_p3 = scmp.lt.s32.totalorder %s427_s7, %s427_s7 }
  0x2a   :  { %342 = vmatprep.subr.mxu0 %v62_v3 }
  0x2b   :  { %343 = vmatpush3.msra.mxu0 %v62_v3  ;;  %p434_p4 = por %p433_p3, %p432_p2 }
  0x2c   :  { %344 = vmatprep.subr.mxu0 %v61_v4 }
  0x2d   :  { %345 = vmatpush3.msra.mxu0 %v61_v4  ;;  %p435_p5 = pnand %p434_p4, %p428_p1 }
  0x2e   :  { %347 = vmatmul.mubr.msk.f32.vlgmr.msra.gmra.mxu0 %vm65_vm0, %v60_v5 }
  0xee   :  { %v348_v7 = vpop.f32.mrf.mxu0 }
  0xf0   :  { %v138_v9 = vpop.f32.mrf.mxu0 }
  0xf1   :  { %350 = vmatpush3.msra.mxu1 %v138_v9 }
  0xf2   :  { %352 = vmatmul.mubr.msk.f32.vlgmr.msra.gmra.mxu1 %vm156_vm2, %v147_v8  ;;  %354 = vmatprep.subr.mxu1 %v458_v6 }
  0xf3   :  { %355 = vmatpush3.msra.mxu1 %v348_v7  ;;  %356 = vmatprep.mubr.msk.f32.mxu1 %vm459_vm1, %v458_v6 }
  0xf6   :  { %357 = vmatmul.mubr.msk.f32.vlgmr.msra.gmra.mxu1 %vm156_vm2, %v148_v10 }
 0x1b2   :  { %v226_v12 = vpop.f32.mrf.mxu1 }
 0x1b3   :  { %v227_v13 = vadd.f32 %v325_v11, %v226_v12 }
 0x1b4   :  { %v353_v14 = vpop.f32.mrf.mxu1 }
 0x1b5   :  { %303 = vst.msk [vmem:[#allocation8] sm:$0xff] %vm65_vm0, %v227_v13 }
 0x1b6   :  { %v299_v15 = vpop.f32.mrf.mxu1 }
 0x1b7   :  { %v300_v16 = vadd.f32 %v325_v11, %v299_v15 }
 0x1b8   :  { %v358_v17 = vpop.f32.mrf.mxu1 }
 0x1b9   :  { %304 = vst.msk [vmem:[#allocation8 + $0x8] sm:$0xff] %vm65_vm0, %v300_v16 }
 0x1ba   :  { %438 = shalt.err (!%p435_p5)
}
 0x1bb   :  { %316 = dma.vmem_to_hbm [thread:$0]  %s311_s6, 256, %s521_s4, [#allocation4], %s455_s20, %s455_s20, %s456_s21  }
 0x1bc   :  { %451 = dma.done.wait [#allocation4], 256  }
 0x1bd   :  { %452 = vsyncadd [#allocation4], 4294967040 }
 0x1be   :  { %320 = vsyncpa [#allocation3], 1 }
 0x1bf   :  { %321 = vsyncpa [#allocation6], 1 }
 0x1c0   :  { %322 = vsyncpa [#allocation4], 1 }

</bundles_post_ra>
